<compile_context>
chip_gen: v7x
topology: tpu7x:2x2x1
jax: 0.10.0
libtpu: 0.0.40
codegen_flags: <defaults>
</compile_context>

<pallas_src>
import jax
import jax.numpy as jnp
from jax.experimental import pallas as pl
from jax.experimental.pallas import tpu as pltpu

# ----- module hyper-parameters (input_shape['2d'] = (C, X, Y), args) -----
B = 2
IN_C, DIM_X, DIM_Y = 4, 16, 16
CONV_CH = 32
RNN_HIDDEN = 32
N_ACTIONS = 6

OH1 = (DIM_X - 3) // 2 + 1          # conv1: k=3, stride=2  -> 7
OW1 = (DIM_Y - 3) // 2 + 1          #                        -> 7
OH2 = OH1 - 2                       # conv2: k=3, stride=1  -> 5
OW2 = OW1 - 2                       #                        -> 5
N_POS = OH2 * OW2                   # 25 spatial positions after conv2
FLAT_DIM = CONV_CH * N_POS          # 800 (PyTorch flattens C*H*W)

GATES = 3                           # GRU gates r, z, n (PyTorch order)
GATE_W = GATES * RNN_HIDDEN         # 96
Q_PAD = 96                          # h_new lives in lanes [Q_PAD, 128)
OUT_W = 128                         # packed output slab width

# ----- single parameter slab layout (rows x 128 lanes, f32) ---------------
SLAB_LANES = 128
ROW_CONV1_B = 0                     # 1 row, lanes [0:32)
ROW_CONV2_B = 1                     # 1 row, lanes [0:32)
ROW_FC1_B   = 2                     # 1 row, lanes [0:32)
ROW_B_IH    = 3                     # 1 row, lanes [0:96)
ROW_B_HH    = 4                     # 1 row, lanes [0:96)
ROW_FC2_B   = 5                     # 1 row, lanes [0:128) (augmented)
ROW_W2      = 8                     # 32 rows, lanes [0:32)  (tap-summed conv2)
ROW_FC1_W   = 40                    # 32 rows, lanes [0:32)  (position-summed fc1)
ROW_W_IH    = 72                    # 32 rows, lanes [0:96)  (gate-concat)
ROW_W_HH    = 104                   # 32 rows, lanes [0:96)  (gate-concat)
ROW_FC2_W   = 136                   # 32 rows, lanes [0:128) (augmented w/ identity)
SLAB_ROWS   = 168


# ---------------------------------------------------------------------------
# Fused kernel: zero-input conv path (folded) + fc1/ReLU + GRUCell + fc2,
# all in VMEM, one lane-dense (B, 128) store straight out of the last matmul.
# ---------------------------------------------------------------------------
def _fused_forward_kernel(slab_ref, h_ref, out_ref):
    H = RNN_HIDDEN
    s = slab_ref

    def elu(a):
        # ELU(alpha=1); expm1 via the exact tanh identity (exp/tanh only).
        return jnp.where(a > 0.0, a, jnp.tanh(0.5 * a) * (jnp.exp(a) + 1.0))

    # ---- batch-invariant prefix at M=1 (module zeroes its 2-D input) ----
    # conv1(0) == bias at every position -> spatially constant.
    y1 = elu(s[ROW_CONV1_B:ROW_CONV1_B + 1, :H])                     # (1, 32)
    # conv2 with tap-summed weights (exact, since y1 is spatially constant).
    y2 = elu(jnp.dot(y1, s[ROW_W2:ROW_W2 + H, :H],
                     preferred_element_type=jnp.float32)
             + s[ROW_CONV2_B:ROW_CONV2_B + 1, :H])                   # (1, 32)
    # fc1 with position-summed weights (exact) + ReLU.
    x = jnp.maximum(jnp.dot(y2, s[ROW_FC1_W:ROW_FC1_W + H, :H],
                            preferred_element_type=jnp.float32)
                    + s[ROW_FC1_B:ROW_FC1_B + 1, :H], 0.0)           # (1, 32)
    # Input half of the GRU gates (batch-invariant).
    gi = jnp.dot(x, s[ROW_W_IH:ROW_W_IH + H, :GATE_W],
                 preferred_element_type=jnp.float32) \
        + s[ROW_B_IH:ROW_B_IH + 1, :GATE_W]                          # (1, 96)

    # ---- recurrent half (carries the batch dimension) ----
    h = h_ref[...]                                                   # (B, 32)
    gh = jnp.dot(h, s[ROW_W_HH:ROW_W_HH + H, :GATE_W],
                 preferred_element_type=jnp.float32) \
        + s[ROW_B_HH:ROW_B_HH + 1, :GATE_W]                          # (B, 96)

    r = jax.nn.sigmoid(gi[:, 0:H] + gh[:, 0:H])
    z = jax.nn.sigmoid(gi[:, H:2 * H] + gh[:, H:2 * H])
    n = jnp.tanh(gi[:, 2 * H:3 * H] + r * gh[:, 2 * H:3 * H])
    h_new = (1.0 - z) * n + z * h                                    # (B, 32)

    # fc2 augmented with an identity block: result IS the packed output slab
    # (q in lanes [0:N_ACTIONS), h_new in lanes [Q_PAD:128)).
    out_ref[...] = jnp.dot(h_new, s[ROW_FC2_W:ROW_FC2_W + H, :],
                           preferred_element_type=jnp.float32) \
        + s[ROW_FC2_B:ROW_FC2_B + 1, :]                              # (B, 128)


# ---------------------------------------------------------------------------
# pallas_call plumbing: no grid, 2 inputs (slab + h), whole arrays in VMEM
# (total footprint ~90 KiB -- far under the scoped VMEM limit on any chip).
# ---------------------------------------------------------------------------
_VMEM_SPEC = pl.BlockSpec(memory_space=pltpu.MemorySpace.VMEM)


def _fused_forward_call(slab, h_in):
    return pl.pallas_call(
        _fused_forward_kernel,
        out_shape=jax.ShapeDtypeStruct((B, OUT_W), jnp.float32),
        in_specs=[_VMEM_SPEC, _VMEM_SPEC],
        out_specs=_VMEM_SPEC,
    )(slab, h_in)


def pack_params(params):
    """Trace-time repacking (free under jit; once per parameter set in a real
    step loop): tap-sum conv2, position-sum fc1, gate-concat GRU weights,
    augment fc2 with an identity block, and pack everything into ONE
    lane-padded (SLAB_ROWS, 128) f32 slab."""
    H = RNN_HIDDEN

    # conv2 tap fold: rows of conv2_w_mat are ordered (dy*3+dx)*C + ci.
    w2_sum = params['conv2_w_mat'].reshape(9, CONV_CH, CONV_CH).sum(0)   # (32, 32)
    # fc1 position fold: NCHW flatten order is c*N_POS + (h*OW2 + w).
    fc1_sum = params['fc1_w'].reshape(CONV_CH, N_POS, H).sum(1)          # (32, 32)
    # GRU gate concat (r, z, n).
    w_ih_cat = jnp.transpose(params['w_ih'], (1, 0, 2)).reshape(H, GATE_W)
    w_hh_cat = jnp.transpose(params['w_hh'], (1, 0, 2)).reshape(H, GATE_W)
    b_ih_cat = params['b_ih'].reshape(1, GATE_W)
    b_hh_cat = params['b_hh'].reshape(1, GATE_W)
    # fc2 augmented: [ fc2_w | 0 | I_32 ] so h_new @ fc2_aug packs q and h_new.
    fc2_aug = jnp.zeros((H, OUT_W), jnp.float32)
    fc2_aug = fc2_aug.at[:, :N_ACTIONS].set(params['fc2_w'])
    fc2_aug = fc2_aug.at[:, Q_PAD:Q_PAD + H].set(jnp.eye(H, dtype=jnp.float32))
    fc2_b_aug = jnp.zeros((1, OUT_W), jnp.float32)
    fc2_b_aug = fc2_b_aug.at[:, :N_ACTIONS].set(params['fc2_b'])

    slab = jnp.zeros((SLAB_ROWS, SLAB_LANES), jnp.float32)
    slab = slab.at[ROW_CONV1_B:ROW_CONV1_B + 1, :CONV_CH].set(params['conv1_b'])
    slab = slab.at[ROW_CONV2_B:ROW_CONV2_B + 1, :CONV_CH].set(params['conv2_b'])
    slab = slab.at[ROW_FC1_B:ROW_FC1_B + 1, :H].set(params['fc1_b'])
    slab = slab.at[ROW_B_IH:ROW_B_IH + 1, :GATE_W].set(b_ih_cat)
    slab = slab.at[ROW_B_HH:ROW_B_HH + 1, :GATE_W].set(b_hh_cat)
    slab = slab.at[ROW_FC2_B:ROW_FC2_B + 1, :].set(fc2_b_aug)
    slab = slab.at[ROW_W2:ROW_W2 + H, :CONV_CH].set(w2_sum)
    slab = slab.at[ROW_FC1_W:ROW_FC1_W + H, :H].set(fc1_sum)
    slab = slab.at[ROW_W_IH:ROW_W_IH + H, :GATE_W].set(w_ih_cat)
    slab = slab.at[ROW_W_HH:ROW_W_HH + H, :GATE_W].set(w_hh_cat)
    slab = slab.at[ROW_FC2_W:ROW_FC2_W + H, :].set(fc2_aug)
    return slab


def rnn_conv_ddpg_noid_forward(params, inputs_2d_nchw, hidden_state):
    # Faithful to the module: forward starts with `inp = th.zeros_like(...)`,
    # so only the (static) observation shape matters — no data is read.
    assert inputs_2d_nchw.shape == (B, IN_C, DIM_X, DIM_Y)
    h_in = hidden_state.reshape(-1, RNN_HIDDEN).astype(jnp.float32)
    slab = pack_params(params)
    out = _fused_forward_call(slab, h_in)          # (B, 128) lane-dense slab
    q = out[:, :N_ACTIONS]
    h = out[:, Q_PAD:Q_PAD + RNN_HIDDEN]
    return q, h


# ---------------------------------------------------------------------------
# Pure-JAX reference: runs the FULL genuine conv/im2col path (no algebraic
# shortcuts, original weight layouts) — validates every pack-time fold.
# ---------------------------------------------------------------------------
def im2col(x_nhwc, kh, kw, stride):
    Bn, Hh, Ww, C = x_nhwc.shape
    OH = (Hh - kh) // stride + 1
    OW = (Ww - kw) // stride + 1
    cols = []
    for dy in range(kh):
        for dx in range(kw):
            cols.append(x_nhwc[:, dy:dy + stride * (OH - 1) + 1:stride,
                               dx:dx + stride * (OW - 1) + 1:stride, :])
    patches = jnp.concatenate(cols, axis=-1)      # (dy, dx, c) column order
    return patches.reshape(Bn * OH * OW, kh * kw * C), OH, OW


def reference_forward(params, inputs_2d_nchw, hidden_state):
    inp = jnp.zeros_like(inputs_2d_nchw).astype(jnp.float32)
    x = jnp.transpose(inp, (0, 2, 3, 1))          # NCHW -> NHWC

    def conv(xv, wmat, b, stride):
        p, oh, ow = im2col(xv, 3, 3, stride)
        y = p @ wmat + b
        y = jnp.where(y > 0.0, y, jnp.expm1(y))   # ELU
        return y.reshape(xv.shape[0], oh, ow, -1)

    y = conv(x, params['conv1_w_mat'], params['conv1_b'], 2)
    y = conv(y, params['conv2_w_mat'], params['conv2_b'], 1)
    flat = jnp.transpose(y, (0, 3, 1, 2)).reshape(x.shape[0], -1)  # NCHW flatten
    xh = jnp.maximum(flat @ params['fc1_w'] + params['fc1_b'], 0.0)
    h = hidden_state.reshape(-1, RNN_HIDDEN)
    gi = [xh @ params['w_ih'][g] + params['b_ih'][g, 0] for g in range(3)]
    gh = [h @ params['w_hh'][g] + params['b_hh'][g, 0] for g in range(3)]
    r = jax.nn.sigmoid(gi[0] + gh[0])
    z = jax.nn.sigmoid(gi[1] + gh[1])
    n = jnp.tanh(gi[2] + r * gh[2])
    h_new = (1.0 - z) * n + z * h
    q = h_new @ params['fc2_w'] + params['fc2_b']
    return q, h_new


# ---------------------------------------------------------------------------
# Deterministic synthetic parameters (shapes from the module's __init__).
# NOTE: orthogonal init is not reproduced (init-only, no forward semantics).
# ---------------------------------------------------------------------------
def init_params(key):
    ks = jax.random.split(key, 10)

    def nrm(k, shape, scale=0.1):
        return scale * jax.random.normal(k, shape, dtype=jnp.float32)

    conv1_w = nrm(ks[0], (3, 3, IN_C, CONV_CH))        # HWIO
    conv2_w = nrm(ks[1], (3, 3, CONV_CH, CONV_CH))     # HWIO
    return {
        'conv1_w_mat': conv1_w.reshape(3 * 3 * IN_C, CONV_CH),
        'conv1_b': nrm(ks[2], (1, CONV_CH)),
        'conv2_w_mat': conv2_w.reshape(3 * 3 * CONV_CH, CONV_CH),
        'conv2_b': nrm(ks[3], (1, CONV_CH)),
        'fc1_w': nrm(ks[4], (FLAT_DIM, RNN_HIDDEN)),
        'fc1_b': nrm(ks[5], (1, RNN_HIDDEN)),
        'w_ih': nrm(ks[6], (3, RNN_HIDDEN, RNN_HIDDEN)),   # gates r, z, n
        'w_hh': nrm(ks[7], (3, RNN_HIDDEN, RNN_HIDDEN)),
        'b_ih': nrm(ks[8], (3, 1, RNN_HIDDEN)),
        'b_hh': nrm(ks[9], (3, 1, RNN_HIDDEN)),
        'fc2_w': nrm(jax.random.fold_in(key, 100), (RNN_HIDDEN, N_ACTIONS)),
        'fc2_b': nrm(jax.random.fold_in(key, 101), (1, N_ACTIONS)),
    }


if __name__ == "__main__":
    key = jax.random.PRNGKey(0)
    k_x, k_h, k_p = jax.random.split(key, 3)

    # PyTorch-style NCHW observation and hidden state
    x = jax.random.normal(k_x, (B, IN_C, DIM_X, DIM_Y), dtype=jnp.float32)
    hidden = jax.random.normal(k_h, (B, RNN_HIDDEN), dtype=jnp.float32)
    params = init_params(k_p)

    fwd = jax.jit(rnn_conv_ddpg_noid_forward)
    q, h = fwd(params, x, hidden)
    q = jax.block_until_ready(q)
    h = jax.block_until_ready(h)

    q_ref, h_ref = reference_forward(params, x, hidden)
    assert q.shape == (B, N_ACTIONS) and h.shape == (B, RNN_HIDDEN)
    assert jnp.allclose(q, q_ref, atol=1e-3, rtol=1e-3)
    assert jnp.allclose(h, h_ref, atol=1e-3, rtol=1e-3)

    print("KERNEL_OK")
</pallas_src>

<mosaic_0001>
module attributes {stable_mosaic.version = 11 : i64} {
  func.func @_fused_forward_kernel(%arg0: memref<168x128xf32, #tpu.memory_space<vmem>>, %arg1: memref<2x32xf32, #tpu.memory_space<vmem>>, %arg2: memref<2x128xf32, #tpu.memory_space<vmem>>) attributes {dimension_semantics = [], scalar_prefetch = 0 : i64, scratch_operands = 0 : i64, tpu.core_type = #tpu.core_type<tc>} {
    %c0 = arith.constant 0 : index
    %c0_0 = arith.constant 0 : index
    %0 = vector.load %arg0[%c0, %c0_0] : memref<168x128xf32, #tpu.memory_space<vmem>>, vector<1x32xf32>
    %cst = arith.constant 0.000000e+00 : f32
    %1 = vector.broadcast %cst : f32 to vector<1x32xf32>
    %2 = arith.cmpf ogt, %0, %1 : vector<1x32xf32>
    %cst_1 = arith.constant 5.000000e-01 : f32
    %3 = vector.broadcast %cst_1 : f32 to vector<1x32xf32>
    %4 = arith.mulf %3, %0 : vector<1x32xf32>
    %5 = math.tanh %4 : vector<1x32xf32>
    %6 = math.exp %0 : vector<1x32xf32>
    %cst_2 = arith.constant 1.000000e+00 : f32
    %7 = vector.broadcast %cst_2 : f32 to vector<1x32xf32>
    %8 = arith.addf %6, %7 : vector<1x32xf32>
    %9 = arith.mulf %5, %8 : vector<1x32xf32>
    %10 = arith.select %2, %0, %9 : vector<1x32xi1>, vector<1x32xf32>
    %c8 = arith.constant 8 : index
    %c0_3 = arith.constant 0 : index
    %11 = vector.load %arg0[%c8, %c0_3] : memref<168x128xf32, #tpu.memory_space<vmem>>, vector<32x32xf32>
    %cst_4 = arith.constant dense<0.000000e+00> : vector<1x32xf32>
    %12 = tpu.matmul %10, %11, %cst_4 {dimension_numbers = #tpu.dot_dimension_numbers<[1], [0], [0], [1], [0, 0, 1, 1], [], []>} : vector<1x32xf32>, vector<32x32xf32>, vector<1x32xf32> -> vector<1x32xf32>
    %c1 = arith.constant 1 : index
    %c0_5 = arith.constant 0 : index
    %13 = vector.load %arg0[%c1, %c0_5] : memref<168x128xf32, #tpu.memory_space<vmem>>, vector<1x32xf32>
    %14 = arith.addf %12, %13 : vector<1x32xf32>
    %cst_6 = arith.constant 0.000000e+00 : f32
    %15 = vector.broadcast %cst_6 : f32 to vector<1x32xf32>
    %16 = arith.cmpf ogt, %14, %15 : vector<1x32xf32>
    %cst_7 = arith.constant 5.000000e-01 : f32
    %17 = vector.broadcast %cst_7 : f32 to vector<1x32xf32>
    %18 = arith.mulf %17, %14 : vector<1x32xf32>
    %19 = math.tanh %18 : vector<1x32xf32>
    %20 = math.exp %14 : vector<1x32xf32>
    %cst_8 = arith.constant 1.000000e+00 : f32
    %21 = vector.broadcast %cst_8 : f32 to vector<1x32xf32>
    %22 = arith.addf %20, %21 : vector<1x32xf32>
    %23 = arith.mulf %19, %22 : vector<1x32xf32>
    %24 = arith.select %16, %14, %23 : vector<1x32xi1>, vector<1x32xf32>
    %c40 = arith.constant 40 : index
    %c0_9 = arith.constant 0 : index
    %25 = vector.load %arg0[%c40, %c0_9] : memref<168x128xf32, #tpu.memory_space<vmem>>, vector<32x32xf32>
    %cst_10 = arith.constant dense<0.000000e+00> : vector<1x32xf32>
    %26 = tpu.matmul %24, %25, %cst_10 {dimension_numbers = #tpu.dot_dimension_numbers<[1], [0], [0], [1], [0, 0, 1, 1], [], []>} : vector<1x32xf32>, vector<32x32xf32>, vector<1x32xf32> -> vector<1x32xf32>
    %c2 = arith.constant 2 : index
    %c0_11 = arith.constant 0 : index
    %27 = vector.load %arg0[%c2, %c0_11] : memref<168x128xf32, #tpu.memory_space<vmem>>, vector<1x32xf32>
    %28 = arith.addf %26, %27 : vector<1x32xf32>
    %cst_12 = arith.constant 0.000000e+00 : f32
    %29 = vector.broadcast %cst_12 : f32 to vector<1x32xf32>
    %30 = arith.maximumf %28, %29 : vector<1x32xf32>
    %c72 = arith.constant 72 : index
    %c0_13 = arith.constant 0 : index
    %31 = vector.load %arg0[%c72, %c0_13] : memref<168x128xf32, #tpu.memory_space<vmem>>, vector<32x96xf32>
    %cst_14 = arith.constant dense<0.000000e+00> : vector<1x96xf32>
    %32 = tpu.matmul %30, %31, %cst_14 {dimension_numbers = #tpu.dot_dimension_numbers<[1], [0], [0], [1], [0, 0, 1, 1], [], []>} : vector<1x32xf32>, vector<32x96xf32>, vector<1x96xf32> -> vector<1x96xf32>
    %c3 = arith.constant 3 : index
    %c0_15 = arith.constant 0 : index
    %33 = vector.load %arg0[%c3, %c0_15] : memref<168x128xf32, #tpu.memory_space<vmem>>, vector<1x96xf32>
    %34 = arith.addf %32, %33 : vector<1x96xf32>
    %c0_16 = arith.constant 0 : index
    %c0_17 = arith.constant 0 : index
    %35 = vector.load %arg1[%c0_16, %c0_17] : memref<2x32xf32, #tpu.memory_space<vmem>>, vector<2x32xf32>
    %c104 = arith.constant 104 : index
    %c0_18 = arith.constant 0 : index
    %36 = vector.load %arg0[%c104, %c0_18] : memref<168x128xf32, #tpu.memory_space<vmem>>, vector<32x96xf32>
    %cst_19 = arith.constant dense<0.000000e+00> : vector<2x96xf32>
    %37 = tpu.matmul %35, %36, %cst_19 {dimension_numbers = #tpu.dot_dimension_numbers<[1], [0], [0], [1], [0, 0, 1, 1], [], []>} : vector<2x32xf32>, vector<32x96xf32>, vector<2x96xf32> -> vector<2x96xf32>
    %c4 = arith.constant 4 : index
    %c0_20 = arith.constant 0 : index
    %38 = vector.load %arg0[%c4, %c0_20] : memref<168x128xf32, #tpu.memory_space<vmem>>, vector<1x96xf32>
    %39 = vector.broadcast %38 : vector<1x96xf32> to vector<2x96xf32>
    %40 = arith.addf %37, %39 : vector<2x96xf32>
    %41 = vector.extract_strided_slice %34 {offsets = [0, 0], sizes = [1, 32], strides = [1, 1]} : vector<1x96xf32> to vector<1x32xf32>
    %42 = vector.extract_strided_slice %40 {offsets = [0, 0], sizes = [2, 32], strides = [1, 1]} : vector<2x96xf32> to vector<2x32xf32>
    %43 = vector.broadcast %41 : vector<1x32xf32> to vector<2x32xf32>
    %44 = arith.addf %43, %42 : vector<2x32xf32>
    %45 = arith.negf %44 : vector<2x32xf32>
    %46 = math.exp %45 : vector<2x32xf32>
    %cst_21 = arith.constant 1.000000e+00 : f32
    %47 = vector.broadcast %cst_21 : f32 to vector<2x32xf32>
    %48 = arith.addf %47, %46 : vector<2x32xf32>
    %49 = arith.divf %47, %48 : vector<2x32xf32>
    %50 = vector.extract_strided_slice %34 {offsets = [0, 32], sizes = [1, 32], strides = [1, 1]} : vector<1x96xf32> to vector<1x32xf32>
    %51 = vector.extract_strided_slice %40 {offsets = [0, 32], sizes = [2, 32], strides = [1, 1]} : vector<2x96xf32> to vector<2x32xf32>
    %52 = vector.broadcast %50 : vector<1x32xf32> to vector<2x32xf32>
    %53 = arith.addf %52, %51 : vector<2x32xf32>
    %54 = arith.negf %53 : vector<2x32xf32>
    %55 = math.exp %54 : vector<2x32xf32>
    %cst_22 = arith.constant 1.000000e+00 : f32
    %56 = vector.broadcast %cst_22 : f32 to vector<2x32xf32>
    %57 = arith.addf %56, %55 : vector<2x32xf32>
    %58 = arith.divf %56, %57 : vector<2x32xf32>
    %59 = vector.extract_strided_slice %34 {offsets = [0, 64], sizes = [1, 32], strides = [1, 1]} : vector<1x96xf32> to vector<1x32xf32>
    %60 = vector.extract_strided_slice %40 {offsets = [0, 64], sizes = [2, 32], strides = [1, 1]} : vector<2x96xf32> to vector<2x32xf32>
    %61 = arith.mulf %49, %60 : vector<2x32xf32>
    %62 = vector.broadcast %59 : vector<1x32xf32> to vector<2x32xf32>
    %63 = arith.addf %62, %61 : vector<2x32xf32>
    %64 = math.tanh %63 : vector<2x32xf32>
    %cst_23 = arith.constant 1.000000e+00 : f32
    %65 = vector.broadcast %cst_23 : f32 to vector<2x32xf32>
    %66 = arith.subf %65, %58 : vector<2x32xf32>
    %67 = arith.mulf %66, %64 : vector<2x32xf32>
    %68 = arith.mulf %58, %35 : vector<2x32xf32>
    %69 = arith.addf %67, %68 : vector<2x32xf32>
    %c136 = arith.constant 136 : index
    %c0_24 = arith.constant 0 : index
    %70 = vector.load %arg0[%c136, %c0_24] : memref<168x128xf32, #tpu.memory_space<vmem>>, vector<32x128xf32>
    %cst_25 = arith.constant dense<0.000000e+00> : vector<2x128xf32>
    %71 = tpu.matmul %69, %70, %cst_25 {dimension_numbers = #tpu.dot_dimension_numbers<[1], [0], [0], [1], [0, 0, 1, 1], [], []>} : vector<2x32xf32>, vector<32x128xf32>, vector<2x128xf32> -> vector<2x128xf32>
    %c5 = arith.constant 5 : index
    %c0_26 = arith.constant 0 : index
    %72 = vector.load %arg0[%c5, %c0_26] : memref<168x128xf32, #tpu.memory_space<vmem>>, vector<1x128xf32>
    %73 = vector.broadcast %72 : vector<1x128xf32> to vector<2x128xf32>
    %74 = arith.addf %71, %73 : vector<2x128xf32>
    %c0_27 = arith.constant 0 : index
    %c0_28 = arith.constant 0 : index
    %75 = vector.load %arg2[%c0_27, %c0_28] : memref<2x128xf32, #tpu.memory_space<vmem>>, vector<2x128xf32>
    tpu.vector_store %arg2[%c0_27, %c0_28], %74 {strides = array<i32>} : memref<2x128xf32, #tpu.memory_space<vmem>>, vector<2x128xf32>,
    return
  }
}

</mosaic_0001>

<bundles_post_ra>
// kernel: rnn_conv_ddpg_noid_forward.1
= control target key start
LH: loop header
LB: loop body
LE: loop exit
PB: predicated region body
PF: predicated region fallthrough
CT: control target
= control target key end

     0   :  { %v607_v0 = vmov 0.0|0.0   ;;  %vm608_vm0 = vmmov 0   ;;  %v609_v4 = vmov 0.0   ;;  %vm25_vm2 = vcmask 261120   ;;  %s610_s22 = smov 64   ;;  %s611_s5 = smov 96   ;;  %s737_s0 = inlined_call_operand.vmem [shape: f32[168,128], index: 0, kind: input, shape index: {}]   ;;  %s738_s1 = inlined_call_operand.vmem [shape: f32[2,32], index: 1, kind: input, shape index: {}]   ;;  %s739_s2 = inlined_call_operand.vmem [shape: f32[2,128], index: 2, kind: output, shape index: {}]  }
   0x1   :  { %557 = vmatprep.subr.bf16.mxu0 %v607_v0  ;;  %v20_v1 = vld [vmem:[%s737_s0 + $0x8] sm:$0xff]  ;;  %v21_v2 = vld [vmem:[%s737_s0 + $0x10] sm:$0xff]  ;;  %v22_v3 = vld [vmem:[%s737_s0 + $0x18] sm:$0xff]  ;;  %510 = vmatprep.mubr.msk.f32.mxu0 %vm608_vm0, %v609_v4  ;;  %v347_v55 = vlaneseq  ;;  %s612_s6 = smov 32  }
   0x2   :  { %v558_v5 = vpack.c.bf16 %v21_v2, %v20_v1  ;;  %v23_v6 = vld [vmem:[%s737_s0 + $0x20] sm:$0xff]  ;;  %563 = vmatprep.subr.bf16.mxu1 %v607_v0  ;;  %521 = vmatprep.mubr.msk.f32.mxu1 %vm608_vm0, %v609_v4  ;;  %v107_v16 = vld [vmem:[%s737_s0 + $0x28] sm:$0xff]  ;;  %v108_v17 = vld [vmem:[%s737_s0 + $0x30] sm:$0xff] }
   0x3   :  { %v11_v7 = vld [vmem:[%s737_s0] sm:$0x1]  ;;  %v561_v10 = vpack.c.bf16 %v23_v6, %v22_v3  ;;  %v109_v18 = vld [vmem:[%s737_s0 + $0x38] sm:$0xff]  ;;  %v564_v19 = vpack.c.bf16 %v108_v17, %v107_v16  ;;  %v186_v22 = vld [vmem:[%s737_s0 + $0x48] sm:$0xff]  ;;  %v348_v56 = vshrl.u32 %v347_v55, 7 }
   0x4   :  { %v13_v8 = vmul.f32 0.5, %v11_v7  ;;  %v15_v9 = vmul.f32 1.442695, %v11_v7  ;;  %559 = vmatpush3.bf16.msra.mxu0 %v558_v5  ;;  %vm12_vm1 = vcmp.gt.f32.partialorder %v11_v7, 0.0  ;;  %v110_v20 = vld [vmem:[%s737_s0 + $0x40] sm:$0xff]  ;;  %v187_v23 = vld [vmem:[%s737_s0 + $0x50] sm:$0xff] }
   0x5   :  { %560 = vmatprep.subr.bf16.mxu0 %v607_v0  ;;  %565 = vmatpush3.bf16.msra.mxu1 %v564_v19  ;;  %v567_v21 = vpack.c.bf16 %v110_v20, %v109_v18  ;;  %v570_v24 = vpack.c.bf16 %v187_v23, %v186_v22  ;;  %v24_v25 = vld [vmem:[%s737_s0 + $0x1] sm:$0x1]  ;;  %v265_v32 = vld [vmem:[%s737_s0 + $0x68] sm:$0xff]  ;;  %v266_v33 = vld [vmem:[%s737_s0 + $0x70] sm:$0xff]  ;;  %v349_v58 = vsub.s32 0, %v348_v56 }
   0x6   :  { %593 = vtanh.f32 %v13_v8  ;;  %566 = vmatprep.subr.bf16.mxu1 %v607_v0  ;;  %v576_v37 = vpack.c.bf16 %v266_v33, %v265_v32  ;;  %v267_v38 = vld [vmem:[%s737_s0 + $0x78] sm:$0xff]  ;;  %v268_v39 = vld [vmem:[%s737_s0 + $0x80] sm:$0xff] }
   0x7   :  { %595 = vpow2.f32 %v15_v9  ;;  %v579_v41 = vpack.c.bf16 %v268_v39, %v267_v38  ;;  %v264_v42 = vld [vmem:[%s738_s1] sm:$0x3]  ;;  %v188_v43 = vld [vmem:[%s737_s0 + $0x58] sm:$0xff]  ;;  %v111_v46 = vld [vmem:[%s737_s0 + $0x2] sm:$0x1] }
   0x8   :  { %562 = vmatpush3.bf16.msra.mxu0 %v561_v10  ;;  %v189_v44 = vld [vmem:[%s737_s0 + $0x60] sm:$0xff]  ;;  %v380_v9 = vld [vmem:[%s737_s0 + $0x88] sm:$0xff]  ;;  %v381_v10 = vld [vmem:[%s737_s0 + $0x90] sm:$0xff] }
   0x9   :  { %569 = vmatprep.subr.bf16.mxu0 %v607_v0  ;;  %568 = vmatpush3.bf16.msra.mxu1 %v567_v21  ;;  %v573_v45 = vpack.c.bf16 %v189_v44, %v188_v43  ;;  %v472_v51 = vld [vmem:[%s737_s0 + $0x4] ss:$0 sm:$0xff]  ;;  %v190_v57 = vld [vmem:[%s737_s0 + $0x3] sm:$0x1]  ;;  %v475_v23 = vld [vmem:[%s737_s0 + $0x5] ss:$0 sm:$0xff] }
   0xa   :  { %575 = vmatprep.subr.bf16.mxu1 %v607_v0 }
  0x10   :  { %v594_v11 = vpop.eup %593 }
  0x11   :  { %v596_v12 = vpop.eup %595 }
  0x12   :  { %v17_v13 = vadd.f32 1.0, %v596_v12  ;;  %v582_v12 = vpack.c.bf16 %v381_v10, %v380_v9 }
  0x14   :  { %v18_v14 = vmul.f32 %v594_v11, %v17_v13  ;;  %v382_v11 = vld [vmem:[%s737_s0 + $0x98] sm:$0xff]  ;;  %v383_v13 = vld [vmem:[%s737_s0 + $0xa0] sm:$0xff] }
  0x16   :  { %v19_v15 = vsel %vm12_vm1, %v11_v7, %v18_v14  ;;  %v585_v14 = vpack.c.bf16 %v383_v13, %v382_v11 }
  0x17   :  { %511 = vmatmul.mubr.msk.f32.vlgmr.msra.gmra.mrb[0].mxu0 %vm25_vm2, %v19_v15 }
  0x18   :  { %532 = vmatprep.mubr.msk.f32.mxu0 %vm608_vm0, %v609_v4  ;;  %571 = vmatpush3.bf16.msra.mxu0 %v570_v24 }
  0x19   :  { %572 = vmatprep.subr.bf16.mxu0 %v607_v0 }
  0x1c   :  { %574 = vmatpush3.bf16.msra.mxu0 %v573_v45 }
  0x1d   :  { %581 = vmatprep.subr.bf16.mxu0 %v607_v0 }
  0xea   :  { %v95_v26 = vpop.f32.mrb[0].mxu0 }
  0xeb   :  { %v96_v27 = vadd.f32 %v95_v26, %v24_v25  ;;  %v512_v28 = vpop.f32.mrb[1].mxu0 }
  0xed   :  { %v102_v29 = vmul.f32 1.442695, %v96_v27  ;;  %v100_v30 = vmul.f32 0.5, %v96_v27  ;;  %vm99_vm3 = vcmp.gt.f32.partialorder %v96_v27, 0.0 }
  0xef   :  { %597 = vpow2.f32 %v102_v29 }
  0xf0   :  { %599 = vtanh.f32 %v100_v30 }
  0xf9   :  { %v598_v31 = vpop.eup %597 }
  0xfa   :  { %v104_v34 = vadd.f32 1.0, %v598_v31  ;;  %v600_v35 = vpop.eup %599 }
  0xfc   :  { %v105_v36 = vmul.f32 %v600_v35, %v104_v34 }
  0xfe   :  { %v106_v40 = vsel %vm99_vm3, %v96_v27, %v105_v36 }
  0xff   :  { %522 = vmatmul.mubr.msk.f32.vlgmr.msra.gmra.mrb[0].mxu1 %vm25_vm2, %v106_v40 }
 0x100   :  { %577 = vmatpush3.bf16.msra.mxu1 %v576_v37  ;;  %543 = vmatprep.mubr.msk.f32.mxu1 %vm608_vm0, %v609_v4 }
 0x101   :  { %578 = vmatprep.subr.bf16.mxu1 %v607_v0 }
 0x104   :  { %580 = vmatpush3.bf16.msra.mxu1 %v579_v41 }
 0x107   :  { %544 = vmatmul.mubr.msk.f32.vlgmr.msra.gmra.mrb[2].mxu1 %vm25_vm2, %v264_v42 }
 0x1d2   :  { %v181_v47 = vpop.f32.mrb[0].mxu1 }
 0x1d3   :  { %v182_v48 = vadd.f32 %v181_v47, %v111_v46  ;;  %v523_v49 = vpop.f32.mrb[1].mxu1 }
 0x1d5   :  { %v185_v50 = vmax.f32 %v182_v48, 0.0 }
 0x1d7   :  { %533 = vmatmul.mubr.msk.f32.vlgmr.msra.gmra.mrb[2].mxu0 %vm25_vm2, %v185_v50 }
 0x1d8   :  { %554 = vmatprep.mubr.msk.f32.mxu0 %vm608_vm0, %v609_v4  ;;  %583 = vmatpush3.bf16.msra.mxu0 %v582_v12 }
 0x1d9   :  { %584 = vmatprep.subr.bf16.mxu0 %v607_v0 }
 0x1da   :  { %v343_v52 = vpop.f32.mrb[2].mxu1 }
 0x1db   :  { %v344_v53 = vadd.f32 %v472_v51, %v343_v52  ;;  %v545_v54 = vpop.f32.mrb[3].mxu1 }
 0x1dc   :  { %586 = vmatpush3.bf16.msra.mxu0 %v585_v14 }
 0x1dd   :  { %359 = vrot.lane.b32.xlu0 %v344_v53, %s610_s22 }
 0x24f   :  { %v360_v4 = vpop.permute.xlu0 %359 }
 0x2aa   :  { %v260_v59 = vpop.f32.mrb[2].mxu0 }
 0x2ab   :  { %v261_v60 = vadd.f32 %v260_v59, %v190_v57  ;;  %v534_v61 = vpop.f32.mrb[3].mxu0 }
 0x2ad   :  { %v350_v62 = vrot.slane %v261_v60, %v349_v58 }
 0x2af   :  { %v351_v63 = vadd.f32 %v350_v62, %v344_v53 }
 0x2b1   :  { %v474_v1 = vmul.f32 -1.442695, %v351_v63 }
 0x2b3   :  { %601 = vpow2.f32 %v474_v1 }
 0x2bd   :  { %v602_v2 = vpop.eup %601 }
 0x2be   :  { %v355_v3 = vadd.f32 1.0, %v602_v2 }
 0x2c0   :  { %603 = vrcp.f32 %v355_v3 }
 0x2ca   :  { %v604_v5 = vpop.eup %603 }
 0x2cb   :  { %v362_v6 = vmul.f32 %v604_v5, %v360_v4  ;;  %v369_v17 = vsub.f32 1.0, %v604_v5 }
 0x2cd   :  { %364 = vrot.lane.b32.xlu0 %v362_v6, %s610_s22 }
 0x33f   :  { %v365_v7 = vpop.permute.xlu0 %364 }
 0x340   :  { %v367_v8 = vadd.f32 %v365_v7, %v350_v62 }
 0x342   :  { %605 = vtanh.f32 %v367_v8 }
 0x34c   :  { %v606_v15 = vpop.eup %605 }
 0x34d   :  { %371 = vrot.lane.b32.xlu1 %v606_v15, %s611_s5 }
 0x351   :  { %375 = vrot.lane.b32.xlu1 %v264_v42, %s612_s6 }
 0x3bf   :  { %v372_v16 = vpop.permute.xlu1 %371 }
 0x3c0   :  { %v374_v19 = vmul.f32 %v372_v16, %v369_v17 }
 0x3c3   :  { %v376_v18 = vpop.permute.xlu1 %375 }
 0x3c4   :  { %v378_v20 = vmul.f32 %v604_v5, %v376_v18 }
 0x3c6   :  { %v379_v21 = vadd.f32 %v378_v20, %v374_v19 }
 0x3c8   :  { %390 = vrot.lane.b32.xlu0 %v379_v21, %s611_s5 }
 0x43a   :  { %v391_v22 = vpop.permute.xlu0 %390 }
 0x43b   :  { %555 = vmatmul.mubr.msk.f32.vlgmr.msra.gmra.mrb[4].mxu0 %vm25_vm2, %v391_v22 }
 0x50e   :  { %v460_v0 = vpop.f32.mrb[4].mxu0 }
 0x50f   :  { %v461_v24 = vadd.f32 %v475_v23, %v460_v0  ;;  %v556_v25 = vpop.f32.mrb[5].mxu0 }
 0x511   :  { %464 = vst [vmem:[%s739_s2] sm:$0x3] %v461_v24 }

</bundles_post_ra>
